<compile_context>
chip_gen: v6e
topology: v6e:2x2x1
jax: 0.10.0
libtpu: 0.0.40
codegen_flags: <defaults>
</compile_context>

<pallas_src>
import functools

import jax
import jax.numpy as jnp
from jax import lax
from jax.experimental import pallas as pl
from jax.experimental.pallas import tpu as pltpu


def _round_up(x, m):
    return (x + m - 1) // m * m


# ---------------------------------------------------------------------------
# Kernel
# ---------------------------------------------------------------------------
def rnn_agent_kernel(x_ref, h0_ref, w1_ref, b1_ref, wg_ref, bg_ref,
                     w2_ref, b2_ref, q_ref, hout_ref, *scratch,
                     fused, t_total):
    """One (batch_block, time_chunk) grid step: Tt recurrent timesteps."""
    H = hout_ref.shape[-1]
    Tt = x_ref.shape[0]
    cd = w1_ref.dtype            # matmul operand dtype (f32, or bf16)

    # Seed the resident hidden state at the first time chunk of each batch block.
    @pl.when(pl.program_id(1) == 0)
    def _():
        hout_ref[...] = h0_ref[...]

    # Hoisted out of the time loop: ref loads / weight casts (JAX does not CSE
    # these if they sit inside the loop body).
    w1 = w1_ref[...]
    b1 = b1_ref[...]
    bg = bg_ref[...]
    w2 = w2_ref[...]
    b2 = b2_ref[...]
    if fused:
        wg = wg_ref[...]
        xh_ref = scratch[0]          # (Bt, 2H) VMEM staging for [y | h]
    else:
        wg_i = wg_ref[0]             # (H, 3H)  [Wir|Wiz|Win]
        wg_h = wg_ref[1]             # (H, 3H)  [Whr|Whz|Whn]

    t_base = pl.program_id(1) * Tt

    def step(t, h):
        x = x_ref[t]                                            # (Bt, In), cd

        # fc1 + ReLU (MXU, f32 accumulation).
        y = jnp.dot(x, w1, preferred_element_type=jnp.float32) + b1
        y = jnp.maximum(y, 0.0)

        # GRU pre-activations -> [a_r | a_z | i_n | h_n], all f32.
        if fused:
            xh_ref[:, :H] = y.astype(cd)
            xh_ref[:, H:] = h.astype(cd)
            g = jnp.dot(xh_ref[...], wg,
                        preferred_element_type=jnp.float32) + bg
            a_r = g[:, 0:H]
            a_z = g[:, H:2 * H]
            i_n = g[:, 2 * H:3 * H]
            h_n = g[:, 3 * H:4 * H]
        else:
            gi = jnp.dot(y.astype(cd), wg_i,
                         preferred_element_type=jnp.float32)
            gh = jnp.dot(h.astype(cd), wg_h,
                         preferred_element_type=jnp.float32)
            a_r = gi[:, 0:H] + gh[:, 0:H] + bg[:, 0:H]
            a_z = gi[:, H:2 * H] + gh[:, H:2 * H] + bg[:, H:2 * H]
            i_n = gi[:, 2 * H:3 * H] + bg[:, 2 * H:3 * H]
            h_n = gh[:, 2 * H:3 * H] + bg[:, 3 * H:4 * H]

        r = jax.nn.sigmoid(a_r)
        z = jax.nn.sigmoid(a_z)
        n = jnp.tanh(i_n + r * h_n)
        h_new = (1.0 - z) * n + z * h          # gate math stays f32 (v5e-safe)

        # Mask padded tail timesteps so they never corrupt the carried h.
        if t_total is not None:
            h_new = jnp.where(t_base + t < t_total, h_new, h)

        # fc2 -> Q, transposed layout: actions on sublanes, batch on lanes.
        q_t = lax.dot_general(
            w2, h_new.astype(cd),
            dimension_numbers=(((1,), (1,)), ((), ())),
            preferred_element_type=jnp.float32) + b2           # (Aout, Bt)
        q_ref[t] = q_t.astype(q_ref.dtype)
        return h_new

    hout_ref[...] = lax.fori_loop(0, Tt, step, hout_ref[...])


# ---------------------------------------------------------------------------
# Parameter preparation (done ONCE, not per forward call)
# ---------------------------------------------------------------------------
def prepare_params(params, compute_dtype=jnp.float32, fused=None):
    """PyTorch-layout params -> kernel layout.

    fused=True  : (2H, 4H) zero-block weight, single K=2H matmul per step
                  (best for H<=128 on v6e/v7x — fills the 256-deep MXU).
    fused=False : two (H, 3H) weights, no zero-block FLOPs
                  (best on v5e, and for H >= 256 on any generation).
    """
    H = params["w1"].shape[0]
    A = params["w2"].shape[0]
    Aout = _round_up(A, 8)
    f32 = jnp.float32
    if fused is None:
        fused = H <= 128
    # TODO(synk): keep H a multiple of 128; other H works but gate slices
    # become non-lane-aligned (slower cross-lane copies).

    w1_t = params["w1"].T.astype(compute_dtype)                  # (In, H)
    b1 = params["b1"].reshape(1, H).astype(f32)

    Wih, Whh = params["w_ih"], params["w_hh"]                    # (3H, H)
    bih, bhh = params["b_ih"], params["b_hh"]                    # (3H,)
    Wir, Wiz, Win = Wih[:H], Wih[H:2 * H], Wih[2 * H:]
    Whr, Whz, Whn = Whh[:H], Whh[H:2 * H], Whh[2 * H:]
    if fused:
        zero = jnp.zeros((H, H), f32)
        w_gru = jnp.concatenate([
            jnp.concatenate([Wir.T, Wiz.T, Win.T, zero], axis=1),  # input rows
            jnp.concatenate([Whr.T, Whz.T, zero, Whn.T], axis=1),  # hidden rows
        ], axis=0).astype(compute_dtype)                           # (2H, 4H)
    else:
        w_gi = jnp.concatenate([Wir.T, Wiz.T, Win.T], axis=1)      # (H, 3H)
        w_gh = jnp.concatenate([Whr.T, Whz.T, Whn.T], axis=1)      # (H, 3H)
        w_gru = jnp.stack([w_gi, w_gh], axis=0).astype(compute_dtype)

    b_gru = jnp.concatenate([
        bih[:H] + bhh[:H],            # folded r bias
        bih[H:2 * H] + bhh[H:2 * H],  # folded z bias
        bih[2 * H:],                  # b_in (kept separate: r gates the h side)
        bhh[2 * H:],                  # b_hn
    ]).reshape(1, 4 * H).astype(f32)

    # fc2 stored transposed: (Aout, H) so the per-step output is (Aout, Bt)
    # with batch on lanes (lane-dense, near-zero padding waste).
    w2p = jnp.zeros((Aout, H), f32).at[:A].set(params["w2"]).astype(compute_dtype)
    b2p = jnp.zeros((Aout, 1), f32).at[:A, 0].set(params["b2"])

    return {"w1": w1_t, "b1": b1, "w_gru": w_gru, "b_gru": b_gru,
            "w2": w2p, "b2": b2p, "n_actions": A, "hidden": H,
            "fused": fused}


def init_hidden(kparams):
    """Equivalent of RNNAgent.init_hidden: zeros of shape (1, H)."""
    return jnp.zeros((1, kparams["hidden"]), jnp.float32)


# ---------------------------------------------------------------------------
# Wrappers
# ---------------------------------------------------------------------------
def rnn_agent_rollout(x_seq, hidden_state, kparams, *,
                      batch_tile=128, time_chunk=32):
    """T-step rollout. x_seq: (T, B, input_shape), hidden_state: (..., H).
    Returns (q_seq (T, B, n_actions), h_final (B, H))."""
    T, B, In = x_seq.shape
    H = kparams["hidden"]
    A = kparams["n_actions"]
    Aout = kparams["w2"].shape[0]
    cd = kparams["w1"].dtype

    h0 = hidden_state.reshape(-1, H).astype(jnp.float32)

    # batch_tile=128 keeps nb >= 2 for B >= 256 so the "parallel" axis can
    # shard across v7x's two TensorCores.
    Bt = batch_tile if B >= batch_tile else _round_up(B, 8)
    Bpad = _round_up(B, Bt)
    nb = Bpad // Bt

    Tt = min(time_chunk, T)
    n_tc = pl.cdiv(T, Tt)
    Tpad = n_tc * Tt

    # Stream x in the compute dtype (halves HBM read traffic when bf16).
    x_p = x_seq.astype(cd)
    if Bpad != B or Tpad != T:
        x_p = jnp.zeros((Tpad, Bpad, In), cd).at[:T, :B].set(x_p)
    # Copy h into a fresh padded buffer: input/output aliasing then donates an
    # internal buffer, never the caller's array. (Padded rows start at zero.)
    h_p = jnp.zeros((Bpad, H), jnp.float32).at[:B].set(h0)

    fused = kparams["fused"]
    kernel = functools.partial(rnn_agent_kernel, fused=fused,
                               t_total=(T if Tpad != T else None))

    const2 = lambda b, t: (0, 0)
    const3 = lambda b, t: (0, 0, 0)
    wg = kparams["w_gru"]
    wg_spec = pl.BlockSpec(wg.shape, const2 if wg.ndim == 2 else const3)
    scratch = [pltpu.VMEM((Bt, 2 * H), cd)] if fused else []

    # TODO(synk): on v7x (64 MiB VMEM) with large H/In or deep time chunks,
    # set pltpu.CompilerParams(vmem_limit_bytes=...) explicitly and prefer
    # bf16 weights + the split GRU layout to keep residency small.
    q_pad, h_out = pl.pallas_call(
        kernel,
        grid=(nb, n_tc),
        out_shape=(
            jax.ShapeDtypeStruct((Tpad, Aout, Bpad), jnp.float32),
            jax.ShapeDtypeStruct((Bpad, H), jnp.float32),
        ),
        in_specs=[
            pl.BlockSpec((Tt, Bt, In), lambda b, t: (t, b, 0)),   # x chunk
            pl.BlockSpec((Bt, H), lambda b, t: (b, 0)),           # h0
            pl.BlockSpec(kparams["w1"].shape, const2),            # weights /
            pl.BlockSpec(kparams["b1"].shape, const2),            #  biases:
            wg_spec,                                              #  constant
            pl.BlockSpec(kparams["b_gru"].shape, const2),         #  index_map
            pl.BlockSpec(kparams["w2"].shape, const2),            #  => VMEM-
            pl.BlockSpec(kparams["b2"].shape, const2),            #  resident
        ],
        out_specs=(
            pl.BlockSpec((Tt, Aout, Bt), lambda b, t: (t, 0, b)),  # q chunk
            pl.BlockSpec((Bt, H), lambda b, t: (b, 0)),            # h resident
        ),
        scratch_shapes=scratch,
        input_output_aliases={1: 1},          # h_out aliases the h0 buffer
        compiler_params=pltpu.CompilerParams(
            dimension_semantics=("parallel", "arbitrary")),
    )(x_p, h_p, kparams["w1"], kparams["b1"], wg, kparams["b_gru"],
      kparams["w2"], kparams["b2"])

    # (Tpad, Aout, Bpad) -> (T, B, A)
    q = jnp.transpose(q_pad[:T, :A, :B], (0, 2, 1))
    return q, h_out[:B]


def rnn_agent_forward(inputs, hidden_state, kparams):
    """Single step, matching RNNAgent.forward: inputs (B, input_shape)."""
    q_seq, h = rnn_agent_rollout(inputs[None], hidden_state, kparams,
                                 time_chunk=1)
    return q_seq[0], h


# ---------------------------------------------------------------------------
# Synthetic init (PyTorch parameter shapes) + pure-JAX reference
# ---------------------------------------------------------------------------
def init_params(key, input_shape, hidden, n_actions):
    ks = jax.random.split(key, 8)
    u = lambda k, shape, bound: jax.random.uniform(
        k, shape, jnp.float32, minval=-bound, maxval=bound)
    b1v = 1.0 / jnp.sqrt(input_shape)
    bhv = 1.0 / jnp.sqrt(hidden)
    return {
        "w1": u(ks[0], (hidden, input_shape), b1v),      # fc1.weight
        "b1": u(ks[1], (hidden,), b1v),                  # fc1.bias
        "w_ih": u(ks[2], (3 * hidden, hidden), bhv),     # rnn.weight_ih
        "b_ih": u(ks[3], (3 * hidden,), bhv),            # rnn.bias_ih
        "w_hh": u(ks[4], (3 * hidden, hidden), bhv),     # rnn.weight_hh
        "b_hh": u(ks[5], (3 * hidden,), bhv),            # rnn.bias_hh
        "w2": u(ks[6], (n_actions, hidden), bhv),        # fc2.weight
        "b2": u(ks[7], (n_actions,), bhv),               # fc2.bias
    }


def reference_step(x, h, params):
    H = params["w1"].shape[0]
    y = jnp.maximum(x @ params["w1"].T + params["b1"], 0.0)
    h_in = h.reshape(-1, H)
    gi = y @ params["w_ih"].T + params["b_ih"]
    gh = h_in @ params["w_hh"].T + params["b_hh"]
    i_r, i_z, i_n = jnp.split(gi, 3, axis=1)
    h_r, h_z, h_n = jnp.split(gh, 3, axis=1)
    r = jax.nn.sigmoid(i_r + h_r)
    z = jax.nn.sigmoid(i_z + h_z)
    n = jnp.tanh(i_n + r * h_n)
    h_new = (1.0 - z) * n + z * h_in
    q = h_new @ params["w2"].T + params["b2"]
    return q, h_new


def reference_rollout(x_seq, h0, params):
    h = h0
    qs = []
    for t in range(x_seq.shape[0]):
        q, h = reference_step(x_seq[t], h, params)
        qs.append(q)
    return jnp.stack(qs, axis=0), h


if __name__ == "__main__":
    INPUT_SHAPE = 32
    HIDDEN = 128        # rnn_hidden_dim; multiple of 128 keeps gate slices lane-aligned
    N_ACTIONS = 8
    BATCH = 4
    T = 6

    key = jax.random.PRNGKey(0)
    k_x, k_h, k_p = jax.random.split(key, 3)
    x_seq = jax.random.normal(k_x, (T, BATCH, INPUT_SHAPE), jnp.float32)
    hidden = jax.random.normal(k_h, (BATCH, HIDDEN), jnp.float32)
    params = init_params(k_p, INPUT_SHAPE, HIDDEN, N_ACTIONS)

    q1_ref, h1_ref = reference_step(x_seq[0], hidden, params)
    q_seq_ref, h_T_ref = reference_rollout(x_seq, hidden, params)

    # --- fused GRU layout, f32 operands (v6e/v7x default at H<=128) ---
    kp_fused = prepare_params(params, compute_dtype=jnp.float32, fused=True)

    # single step (matches RNNAgent.forward)
    q, h = rnn_agent_forward(x_seq[0], hidden, kp_fused)
    jax.block_until_ready((q, h))
    assert q.shape == (BATCH, N_ACTIONS) and h.shape == (BATCH, HIDDEN)
    assert jnp.allclose(q, q1_ref, atol=1e-3, rtol=1e-3)
    assert jnp.allclose(h, h1_ref, atol=1e-3, rtol=1e-3)

    # T-step rollout; time_chunk=4 < T exercises the padded-tail masking path
    q_seq, h_T = rnn_agent_rollout(x_seq, hidden, kp_fused, time_chunk=4)
    jax.block_until_ready((q_seq, h_T))
    assert q_seq.shape == (T, BATCH, N_ACTIONS) and h_T.shape == (BATCH, HIDDEN)
    assert jnp.allclose(q_seq, q_seq_ref, atol=1e-3, rtol=1e-3)
    assert jnp.allclose(h_T, h_T_ref, atol=1e-3, rtol=1e-3)

    # --- split GRU layout (v5e / H>=256 path), f32 operands ---
    kp_split = prepare_params(params, compute_dtype=jnp.float32, fused=False)
    q_seq_s, h_T_s = rnn_agent_rollout(x_seq, hidden, kp_split)
    jax.block_until_ready((q_seq_s, h_T_s))
    assert jnp.allclose(q_seq_s, q_seq_ref, atol=1e-3, rtol=1e-3)
    assert jnp.allclose(h_T_s, h_T_ref, atol=1e-3, rtol=1e-3)

    # --- bf16 matmul operands (MXU-native on all generations); gate math f32 ---
    kp_bf16 = prepare_params(params, compute_dtype=jnp.bfloat16)
    q_seq_b, h_T_b = rnn_agent_rollout(x_seq, hidden, kp_bf16)
    jax.block_until_ready((q_seq_b, h_T_b))
    assert jnp.allclose(q_seq_b, q_seq_ref, atol=2e-1)
    assert jnp.allclose(h_T_b, h_T_ref, atol=2e-1)

    print("KERNEL_OK")
</pallas_src>

<mosaic_0001>
module attributes {stable_mosaic.version = 11 : i64} {
  func.func @rnn_agent_kernel(%arg0: i32, %arg1: i32, %arg2: memref<1x8x32xf32, #tpu.memory_space<vmem>>, %arg3: memref<8x128xf32, #tpu.memory_space<vmem>>, %arg4: memref<32x128xf32, #tpu.memory_space<vmem>>, %arg5: memref<1x128xf32, #tpu.memory_space<vmem>>, %arg6: memref<256x512xf32, #tpu.memory_space<vmem>>, %arg7: memref<1x512xf32, #tpu.memory_space<vmem>>, %arg8: memref<8x128xf32, #tpu.memory_space<vmem>>, %arg9: memref<8x1xf32, #tpu.memory_space<vmem>>, %arg10: memref<1x8x8xf32, #tpu.memory_space<vmem>>, %arg11: memref<8x128xf32, #tpu.memory_space<vmem>>, %arg12: memref<8x256xf32, #tpu.memory_space<vmem>>) attributes {dimension_semantics = [#tpu.dimension_semantics<parallel>, #tpu.dimension_semantics<arbitrary>], iteration_bounds = array<i64: 1, 1>, scalar_prefetch = 0 : i64, scratch_operands = 1 : i64, tpu.core_type = #tpu.core_type<tc>, window_params = [{transform_indices = @transform_0, window_bounds = array<i64: 1, 8, 32>}, {transform_indices = @transform_1, window_bounds = array<i64: 8, 128>}, {pipeline_mode = #tpu.pipeline_mode<synchronous>, transform_indices = @transform_2, window_bounds = array<i64: 32, 128>}, {pipeline_mode = #tpu.pipeline_mode<synchronous>, transform_indices = @transform_3, window_bounds = array<i64: 1, 128>}, {pipeline_mode = #tpu.pipeline_mode<synchronous>, transform_indices = @transform_4, window_bounds = array<i64: 256, 512>}, {pipeline_mode = #tpu.pipeline_mode<synchronous>, transform_indices = @transform_5, window_bounds = array<i64: 1, 512>}, {pipeline_mode = #tpu.pipeline_mode<synchronous>, transform_indices = @transform_6, window_bounds = array<i64: 8, 128>}, {pipeline_mode = #tpu.pipeline_mode<synchronous>, transform_indices = @transform_7, window_bounds = array<i64: 8, 1>}, {transform_indices = @transform_8, window_bounds = array<i64: 1, 8, 8>}, {transform_indices = @transform_9, window_bounds = array<i64: 8, 128>}]} {
    %c0_i32 = arith.constant 0 : i32
    %0 = arith.cmpi eq, %arg1, %c0_i32 : i32
    %1 = arith.extui %0 : i1 to i32
    %c0_i32_0 = arith.constant 0 : i32
    %2 = arith.cmpi ne, %1, %c0_i32_0 : i32
    scf.if %2 {
      %c0_32 = arith.constant 0 : index
      %c0_33 = arith.constant 0 : index
      %54 = vector.load %arg3[%c0_32, %c0_33] : memref<8x128xf32, #tpu.memory_space<vmem>>, vector<8x128xf32>
      %c0_34 = arith.constant 0 : index
      %c0_35 = arith.constant 0 : index
      %55 = vector.load %arg11[%c0_34, %c0_35] : memref<8x128xf32, #tpu.memory_space<vmem>>, vector<8x128xf32>
      tpu.vector_store %arg11[%c0_34, %c0_35], %54 {strides = array<i32>} : memref<8x128xf32, #tpu.memory_space<vmem>>, vector<8x128xf32>,
    } else {
    }
    %c0 = arith.constant 0 : index
    %c0_1 = arith.constant 0 : index
    %3 = vector.load %arg4[%c0, %c0_1] : memref<32x128xf32, #tpu.memory_space<vmem>>, vector<32x128xf32>
    %c0_2 = arith.constant 0 : index
    %c0_3 = arith.constant 0 : index
    %4 = vector.load %arg5[%c0_2, %c0_3] : memref<1x128xf32, #tpu.memory_space<vmem>>, vector<1x128xf32>
    %c0_4 = arith.constant 0 : index
    %c0_5 = arith.constant 0 : index
    %5 = vector.load %arg7[%c0_4, %c0_5] : memref<1x512xf32, #tpu.memory_space<vmem>>, vector<1x512xf32>
    %c0_6 = arith.constant 0 : index
    %c0_7 = arith.constant 0 : index
    %6 = vector.load %arg8[%c0_6, %c0_7] : memref<8x128xf32, #tpu.memory_space<vmem>>, vector<8x128xf32>
    %c0_8 = arith.constant 0 : index
    %c0_9 = arith.constant 0 : index
    %7 = vector.load %arg9[%c0_8, %c0_9] : memref<8x1xf32, #tpu.memory_space<vmem>>, vector<8x1xf32>
    %c0_10 = arith.constant 0 : index
    %c0_11 = arith.constant 0 : index
    %8 = vector.load %arg6[%c0_10, %c0_11] : memref<256x512xf32, #tpu.memory_space<vmem>>, vector<256x512xf32>
    %c0_12 = arith.constant 0 : index
    %c0_13 = arith.constant 0 : index
    %9 = vector.load %arg11[%c0_12, %c0_13] : memref<8x128xf32, #tpu.memory_space<vmem>>, vector<8x128xf32>
    %c0_i32_14 = arith.constant 0 : i32
    %10 = arith.index_cast %c0_i32_14 : i32 to index
    %c0_15 = arith.constant 0 : index
    %c0_16 = arith.constant 0 : index
    %11 = vector.load %arg2[%10, %c0_15, %c0_16] : memref<1x8x32xf32, #tpu.memory_space<vmem>>, vector<1x8x32xf32>
    %12 = vector.shape_cast %11 : vector<1x8x32xf32> to vector<8x32xf32>
    %cst = arith.constant dense<0.000000e+00> : vector<8x128xf32>
    %13 = tpu.matmul %12, %3, %cst {dimension_numbers = #tpu.dot_dimension_numbers<[1], [0], [0], [1], [0, 0, 1, 1], [], []>} : vector<8x32xf32>, vector<32x128xf32>, vector<8x128xf32> -> vector<8x128xf32>
    %14 = vector.broadcast %4 : vector<1x128xf32> to vector<8x128xf32>
    %15 = arith.addf %13, %14 : vector<8x128xf32>
    %cst_17 = arith.constant 0.000000e+00 : f32
    %16 = vector.broadcast %cst_17 : f32 to vector<8x128xf32>
    %17 = arith.maximumf %15, %16 : vector<8x128xf32>
    %c0_18 = arith.constant 0 : index
    %c0_19 = arith.constant 0 : index
    %18 = vector.load %arg12[%c0_18, %c0_19] : memref<8x256xf32, #tpu.memory_space<vmem>>, vector<8x128xf32>
    tpu.vector_store %arg12[%c0_18, %c0_19], %17 {strides = array<i32>} : memref<8x256xf32, #tpu.memory_space<vmem>>, vector<8x128xf32>,
    %c0_20 = arith.constant 0 : index
    %c128 = arith.constant 128 : index
    %19 = vector.load %arg12[%c0_20, %c128] : memref<8x256xf32, #tpu.memory_space<vmem>>, vector<8x128xf32>
    tpu.vector_store %arg12[%c0_20, %c128], %9 {strides = array<i32>} : memref<8x256xf32, #tpu.memory_space<vmem>>, vector<8x128xf32>,
    %c0_21 = arith.constant 0 : index
    %c0_22 = arith.constant 0 : index
    %20 = vector.load %arg12[%c0_21, %c0_22] : memref<8x256xf32, #tpu.memory_space<vmem>>, vector<8x256xf32>
    %cst_23 = arith.constant dense<0.000000e+00> : vector<8x512xf32>
    %21 = tpu.matmul %20, %8, %cst_23 {dimension_numbers = #tpu.dot_dimension_numbers<[1], [0], [0], [1], [0, 0, 1, 1], [], []>} : vector<8x256xf32>, vector<256x512xf32>, vector<8x512xf32> -> vector<8x512xf32>
    %22 = vector.broadcast %5 : vector<1x512xf32> to vector<8x512xf32>
    %23 = arith.addf %21, %22 : vector<8x512xf32>
    %24 = vector.extract_strided_slice %23 {offsets = [0, 0], sizes = [8, 128], strides = [1, 1]} : vector<8x512xf32> to vector<8x128xf32>
    %25 = vector.extract_strided_slice %23 {offsets = [0, 128], sizes = [8, 128], strides = [1, 1]} : vector<8x512xf32> to vector<8x128xf32>
    %26 = vector.extract_strided_slice %23 {offsets = [0, 256], sizes = [8, 128], strides = [1, 1]} : vector<8x512xf32> to vector<8x128xf32>
    %27 = vector.extract_strided_slice %23 {offsets = [0, 384], sizes = [8, 128], strides = [1, 1]} : vector<8x512xf32> to vector<8x128xf32>
    %28 = arith.negf %24 : vector<8x128xf32>
    %29 = math.exp %28 : vector<8x128xf32>
    %cst_24 = arith.constant 1.000000e+00 : f32
    %30 = vector.broadcast %cst_24 : f32 to vector<8x128xf32>
    %31 = arith.addf %30, %29 : vector<8x128xf32>
    %32 = arith.divf %30, %31 : vector<8x128xf32>
    %33 = arith.negf %25 : vector<8x128xf32>
    %34 = math.exp %33 : vector<8x128xf32>
    %cst_25 = arith.constant 1.000000e+00 : f32
    %35 = vector.broadcast %cst_25 : f32 to vector<8x128xf32>
    %36 = arith.addf %35, %34 : vector<8x128xf32>
    %37 = arith.divf %35, %36 : vector<8x128xf32>
    %38 = arith.mulf %32, %27 : vector<8x128xf32>
    %39 = arith.addf %26, %38 : vector<8x128xf32>
    %40 = math.tanh %39 : vector<8x128xf32>
    %cst_26 = arith.constant 1.000000e+00 : f32
    %41 = vector.broadcast %cst_26 : f32 to vector<8x128xf32>
    %42 = arith.subf %41, %37 : vector<8x128xf32>
    %43 = arith.mulf %42, %40 : vector<8x128xf32>
    %44 = arith.mulf %37, %9 : vector<8x128xf32>
    %45 = arith.addf %43, %44 : vector<8x128xf32>
    %cst_27 = arith.constant dense<0.000000e+00> : vector<8x8xf32>
    %46 = tpu.matmul %6, %45, %cst_27 {dimension_numbers = #tpu.dot_dimension_numbers<[1], [1], [0], [0], [0, 0, 1, 0], [], []>} : vector<8x128xf32>, vector<8x128xf32>, vector<8x8xf32> -> vector<8x8xf32>
    %47 = vector.broadcast %7 : vector<8x1xf32> to vector<8x8xf32>
    %48 = arith.addf %46, %47 : vector<8x8xf32>
    %49 = arith.index_cast %c0_i32_14 : i32 to index
    %c0_28 = arith.constant 0 : index
    %c0_29 = arith.constant 0 : index
    %50 = vector.load %arg10[%49, %c0_28, %c0_29] : memref<1x8x8xf32, #tpu.memory_space<vmem>>, vector<1x8x8xf32>
    %51 = vector.shape_cast %50 : vector<1x8x8xf32> to vector<8x8xf32>
    %52 = vector.shape_cast %48 : vector<8x8xf32> to vector<1x8x8xf32>
    tpu.vector_store %arg10[%49, %c0_28, %c0_29], %52 {strides = array<i32>} : memref<1x8x8xf32, #tpu.memory_space<vmem>>, vector<1x8x8xf32>,
    %c1_i32 = arith.constant 1 : i32
    %c0_30 = arith.constant 0 : index
    %c0_31 = arith.constant 0 : index
    %53 = vector.load %arg11[%c0_30, %c0_31] : memref<8x128xf32, #tpu.memory_space<vmem>>, vector<8x128xf32>
    tpu.vector_store %arg11[%c0_30, %c0_31], %45 {strides = array<i32>} : memref<8x128xf32, #tpu.memory_space<vmem>>, vector<8x128xf32>,
    return
  }
  func.func @transform_0(%arg0: i32, %arg1: i32) -> (i32, i32, i32) {
    %c0_i32 = arith.constant 0 : i32
    %c0_i32_0 = arith.constant 0 : i32
    return %arg1, %arg0, %c0_i32 : i32, i32, i32
  }
  func.func @transform_1(%arg0: i32, %arg1: i32) -> (i32, i32) {
    %c0_i32 = arith.constant 0 : i32
    %c0_i32_0 = arith.constant 0 : i32
    return %arg0, %c0_i32 : i32, i32
  }
  func.func @transform_2(%arg0: i32, %arg1: i32) -> (i32, i32) {
    %c0_i32 = arith.constant 0 : i32
    %c0_i32_0 = arith.constant 0 : i32
    %c0_i32_1 = arith.constant 0 : i32
    return %c0_i32, %c0_i32_0 : i32, i32
  }
  func.func @transform_3(%arg0: i32, %arg1: i32) -> (i32, i32) {
    %c0_i32 = arith.constant 0 : i32
    %c0_i32_0 = arith.constant 0 : i32
    %c0_i32_1 = arith.constant 0 : i32
    return %c0_i32, %c0_i32_0 : i32, i32
  }
  func.func @transform_4(%arg0: i32, %arg1: i32) -> (i32, i32) {
    %c0_i32 = arith.constant 0 : i32
    %c0_i32_0 = arith.constant 0 : i32
    %c0_i32_1 = arith.constant 0 : i32
    return %c0_i32, %c0_i32_0 : i32, i32
  }
  func.func @transform_5(%arg0: i32, %arg1: i32) -> (i32, i32) {
    %c0_i32 = arith.constant 0 : i32
    %c0_i32_0 = arith.constant 0 : i32
    %c0_i32_1 = arith.constant 0 : i32
    return %c0_i32, %c0_i32_0 : i32, i32
  }
  func.func @transform_6(%arg0: i32, %arg1: i32) -> (i32, i32) {
    %c0_i32 = arith.constant 0 : i32
    %c0_i32_0 = arith.constant 0 : i32
    %c0_i32_1 = arith.constant 0 : i32
    return %c0_i32, %c0_i32_0 : i32, i32
  }
  func.func @transform_7(%arg0: i32, %arg1: i32) -> (i32, i32) {
    %c0_i32 = arith.constant 0 : i32
    %c0_i32_0 = arith.constant 0 : i32
    %c0_i32_1 = arith.constant 0 : i32
    return %c0_i32, %c0_i32_0 : i32, i32
  }
  func.func @transform_8(%arg0: i32, %arg1: i32) -> (i32, i32, i32) {
    %c0_i32 = arith.constant 0 : i32
    %c0_i32_0 = arith.constant 0 : i32
    return %arg1, %c0_i32, %arg0 : i32, i32, i32
  }
  func.func @transform_9(%arg0: i32, %arg1: i32) -> (i32, i32) {
    %c0_i32 = arith.constant 0 : i32
    %c0_i32_0 = arith.constant 0 : i32
    return %arg0, %c0_i32 : i32, i32
  }
}

</mosaic_0001>

<bundles_post_ra>
// kernel: tpu_custom_call.1
= control target key start
LH: loop header
LB: loop body
LE: loop exit
PB: predicated region body
PF: predicated region fallthrough
CT: control target
= control target key end

     0   :  { %15 = vsyncpa [#allocation4], 0  ;;  %s923_s0 = inlined_call_operand.hbm [shape: f32[1,8,32], index: 0, kind: input, shape index: {}]   ;;  %s924_s1 = inlined_call_operand.hbm [shape: f32[8,128], index: 1, kind: input, shape index: {}, may-alias: {1,9}]   ;;  %s925_s2 = inlined_call_operand.vmem [shape: f32[32,128], index: 2, kind: input, shape index: {}]   ;;  %s926_s3 = inlined_call_operand.vmem [shape: f32[1,128], index: 3, kind: input, shape index: {}]   ;;  %s927_s4 = inlined_call_operand.hbm [shape: f32[256,512], index: 4, kind: input, shape index: {}]   ;;  %s928_s5 = inlined_call_operand.hbm [shape: f32[1,512], index: 5, kind: input, shape index: {}]   ;;  %s929_s6 = inlined_call_operand.hbm [shape: f32[8,128], index: 6, kind: input, shape index: {}]   ;;  %s930_s7 = inlined_call_operand.vmem [shape: f32[8,1], index: 7, kind: input, shape index: {}]   ;;  %s931_s8 = inlined_call_operand.hbm [shape: f32[1,8,8], index: 8, kind: output, shape index: {0}]   ;;  %s932_s9 = inlined_call_operand.hbm [shape: f32[8,128], index: 9, kind: output, shape index: {1}, may-alias: {1,9}]  }
   0x1   :  { %16 = vsyncpa [#allocation7], 0 }
   0x2   :  { %17 = vsyncpa [#allocation10], 0 }
   0x3   :  { %18 = vsyncpa [#allocation5], 0 }
   0x4   :  { %19 = vsyncpa [#allocation14], 0  ;;  %s813_s30 = smov [#allocation6]   ;;  %s814_s11 = smov [#allocation9]  }
   0x5   :  { %s36_s10 = sshll.u32 %s813_s30, 4  ;;  %s62_s12 = sshll.u32 %s814_s11, 4  ;;  %s37_s10 = int_to_ptr.vmem [resolvable:$true] %s36_s10  ;;  %s63_s12 = int_to_ptr.vmem [resolvable:$true] %s62_s12 }
   0x6   :  { %s671_s13 = scalar_lea.vmem %s37_s10, 128  ;;  %p676_p1 = scmp.lt.s32.totalorder %s37_s10, %s37_s10 }
   0x7   :  { %p672_p0 = scmp.ne.s32.totalorder %s37_s10, %s671_s13  ;;  %p677_p2 = scmp.lt.s32.totalorder %s671_s13, %s671_s13 }
   0x9   :  { %p678_p3 = por %p677_p2, %p676_p1 }
   0xb   :  { %p679_p4 = pnand %p678_p3, %p672_p0 }
   0xd   :  { %682 = shalt.err (!%p679_p4)
}
   0xe   :  { %39 = dma.hbm_to_vmem [thread:$0]  %s924_s1, 128, %s37_s10, [#allocation7]  }
   0xf   :  { %s691_s16 = scalar_lea.vmem %s63_s12, 64  ;;  %p696_p6 = scmp.lt.s32.totalorder %s63_s12, %s63_s12 }
  0x10   :  { %p692_p5 = scmp.ne.s32.totalorder %s63_s12, %s691_s16  ;;  %p697_p7 = scmp.lt.s32.totalorder %s691_s16, %s691_s16 }
  0x12   :  { %p698_p8 = por %p697_p7, %p696_p6 }
  0x14   :  { %p699_p9 = pnand %p698_p8, %p692_p5 }
  0x16   :  { %702 = shalt.err (!%p699_p9)
}
  0x17   :  { %65 = dma.hbm_to_vmem [thread:$0]  %s928_s5, 64, %s63_s12, [#allocation10]  }
  0x18   :  { %s815_s19 = smov [#allocation3]   ;;  %s816_s21 = smov [#allocation8]  }
  0x19   :  { %s26_s20 = sshll.u32 %s815_s19, 4  ;;  %s49_s22 = sshll.u32 %s816_s21, 4  ;;  %s27_s20 = int_to_ptr.vmem [resolvable:$true] %s26_s20  ;;  %s50_s22 = int_to_ptr.vmem [resolvable:$true] %s49_s22 }
  0x1a   :  { %s711_s23 = scalar_lea.vmem %s27_s20, 128  ;;  %p716_p11 = scmp.lt.s32.totalorder %s27_s20, %s27_s20 }
  0x1b   :  { %p712_p10 = scmp.ne.s32.totalorder %s27_s20, %s711_s23  ;;  %p717_p12 = scmp.lt.s32.totalorder %s711_s23, %s711_s23 }
  0x1d   :  { %p718_p13 = por %p717_p12, %p716_p11 }
  0x1f   :  { %p719_p0 = pnand %p718_p13, %p712_p10 }
  0x21   :  { %722 = shalt.err (!%p719_p0)
}
  0x22   :  { %29 = dma.hbm_to_vmem [thread:$0]  %s923_s0, 128, %s27_s20, [#allocation4]  }
  0x23   :  { %s731_s25 = scalar_lea.vmem %s50_s22, 16384  ;;  %p736_p2 = scmp.lt.s32.totalorder %s50_s22, %s50_s22 }
  0x24   :  { %p732_p1 = scmp.ne.s32.totalorder %s50_s22, %s731_s25  ;;  %p737_p3 = scmp.lt.s32.totalorder %s731_s25, %s731_s25 }
  0x26   :  { %p738_p4 = por %p737_p3, %p736_p2 }
  0x28   :  { %p739_p5 = pnand %p738_p4, %p732_p1 }
  0x2a   :  { %742 = shalt.err (!%p739_p5)
}
  0x2b   :  { %s817_s5 = smov 512   ;;  %s818_s26 = smov 32  }
  0x2c   :  { %55 = dma.hbm_to_vmem [thread:$0]  %s927_s4, 16384, %s50_s22, [#allocation7], %s817_s5, %s817_s5, %s818_s26  }
  0x2d   :  { %s819_s29 = smov [#allocation11]  }
  0x2e   :  { %s72_s30 = sshll.u32 %s819_s29, 4  ;;  %s73_s30 = int_to_ptr.vmem [resolvable:$true] %s72_s30 }
  0x2f   :  { %s751_s10 = scalar_lea.vmem %s73_s30, 128  ;;  %p756_p7 = scmp.lt.s32.totalorder %s73_s30, %s73_s30 }
  0x30   :  { %p752_p6 = scmp.ne.s32.totalorder %s73_s30, %s751_s10  ;;  %p757_p8 = scmp.lt.s32.totalorder %s751_s10, %s751_s10 }
  0x32   :  { %p758_p9 = por %p757_p8, %p756_p7 }
  0x34   :  { %p759_p10 = pnand %p758_p9, %p752_p6 }
  0x36   :  { %762 = shalt.err (!%p759_p10)
}
  0x37   :  { %75 = dma.hbm_to_vmem [thread:$0]  %s929_s6, 128, %s73_s30, [#allocation10]  }
  0x38   :  { %803 = dma.done.wait [#allocation4], 128  }
  0x39   :  { %804 = vsyncadd [#allocation4], 4294967168 }
  0x3a   :  { %805 = dma.done.wait [#allocation7], 16512  }
  0x3b   :  { %806 = vsyncadd [#allocation7], 4294950784 }
  0x3c   :  { %807 = dma.done.wait [#allocation10], 192  }
  0x3d   :  { %808 = vsyncadd [#allocation10], 4294967104  ;;  %v820_v0 = vmov 0.0   ;;  %vm821_vm0 = vmmov 0   ;;  %v102_v1 = vld [vmem:[%s925_s2 + $0x18] sm:$0xff]  ;;  %v101_v2 = vld [vmem:[%s925_s2 + $0x10] sm:$0xff] }
  0x3e   :  { %624 = vmatprep.subr.mxu0 %v820_v0  ;;  %632 = vmatprep.mubr.msk.f32.mxu0 %vm821_vm0, %v820_v0  ;;  %v168_v3 = vld [vmem:[#allocation8 + $0x1e8] sm:$0xff]  ;;  %v100_v4 = vld [vmem:[%s925_s2 + $0x8] sm:$0xff]  ;;  %v167_v5 = vld [vmem:[#allocation8 + $0x1e0] sm:$0xff]  ;;  %vm243_vm1 = vcmask 261120  }
  0x3f   :  { %625 = vmatpush3.msra.mxu0 %v102_v1  ;;  %343 = vmatprep.subr.mxu1 %v168_v3  ;;  %v164_v6 = vld [vmem:[#allocation8 + $0x1c8] sm:$0xff]  ;;  %v163_v7 = vld [vmem:[#allocation8 + $0x1c0] sm:$0xff]  ;;  %v99_v8 = vld [vmem:[%s925_s2] sm:$0xff] }
  0x40   :  { %626 = vmatprep.subr.mxu0 %v820_v0  ;;  %344 = vmatpush1.msra.mxu1 %v167_v5  ;;  %v160_v9 = vld [vmem:[#allocation8 + $0x1a8] sm:$0xff]  ;;  %v236_v10 = vld [vmem:[#allocation3] sm:$0xff]  ;;  %v170_v11 = vld [vmem:[#allocation8 + $0x1f8] sm:$0xff] }
  0x41   :  { %627 = vmatpush3.msra.mxu0 %v101_v2  ;;  %345 = vmatprep.subr.mxu1 %v164_v6  ;;  %v159_v12 = vld [vmem:[#allocation8 + $0x1a0] sm:$0xff]  ;;  %v169_v13 = vld [vmem:[#allocation8 + $0x1f0] sm:$0xff]  ;;  %v156_v14 = vld [vmem:[#allocation8 + $0x188] sm:$0xff] }
  0x42   :  { %628 = vmatprep.subr.mxu0 %v820_v0  ;;  %346 = vmatpush1.msra.mxu1 %v163_v7  ;;  %v166_v15 = vld [vmem:[#allocation8 + $0x1d8] sm:$0xff]  ;;  %v155_v16 = vld [vmem:[#allocation8 + $0x180] sm:$0xff]  ;;  %v165_v17 = vld [vmem:[#allocation8 + $0x1d0] sm:$0xff] }
  0x43   :  { %629 = vmatpush3.msra.mxu0 %v100_v4  ;;  %347 = vmatprep.subr.mxu1 %v160_v9  ;;  %v152_v18 = vld [vmem:[#allocation8 + $0x168] sm:$0xff]  ;;  %v162_v19 = vld [vmem:[#allocation8 + $0x1b8] sm:$0xff]  ;;  %v151_v20 = vld [vmem:[#allocation8 + $0x160] sm:$0xff] }
  0x44   :  { %630 = vmatprep.subr.mxu0 %v820_v0  ;;  %348 = vmatpush1.msra.mxu1 %v159_v12  ;;  %v161_v21 = vld [vmem:[#allocation8 + $0x1b0] sm:$0xff]  ;;  %v148_v22 = vld [vmem:[#allocation8 + $0x148] sm:$0xff]  ;;  %v158_v23 = vld [vmem:[#allocation8 + $0x198] sm:$0xff] }
  0x45   :  { %631 = vmatpush3.msra.mxu0 %v99_v8  ;;  %349 = vmatprep.subr.mxu1 %v156_v14  ;;  %v147_v24 = vld [vmem:[#allocation8 + $0x140] sm:$0xff]  ;;  %v157_v25 = vld [vmem:[#allocation8 + $0x190] sm:$0xff]  ;;  %v144_v26 = vld [vmem:[#allocation8 + $0x128] sm:$0xff] }
  0x46   :  { %633 = vmatmul.mubr.msk.f32.vlgmr.msra.gmra.mxu0 %vm243_vm1, %v236_v10  ;;  %414 = vmatprep.subr.mxu0 %v170_v11  ;;  %v154_v27 = vld [vmem:[#allocation8 + $0x178] sm:$0xff]  ;;  %v143_v28 = vld [vmem:[#allocation8 + $0x120] sm:$0xff]  ;;  %v153_v29 = vld [vmem:[#allocation8 + $0x170] sm:$0xff] }
  0x47   :  { %415 = vmatpush1.msra.mxu0 %v169_v13  ;;  %350 = vmatpush1.msra.mxu1 %v155_v16  ;;  %v140_v30 = vld [vmem:[#allocation8 + $0x108] sm:$0xff]  ;;  %v150_v31 = vld [vmem:[#allocation8 + $0x158] sm:$0xff]  ;;  %v139_v32 = vld [vmem:[#allocation8 + $0x100] sm:$0xff] }
  0x48   :  { %416 = vmatprep.subr.mxu0 %v166_v15  ;;  %351 = vmatprep.subr.mxu1 %v152_v18  ;;  %v149_v33 = vld [vmem:[#allocation8 + $0x150] sm:$0xff]  ;;  %v136_v34 = vld [vmem:[#allocation8 + $0xe8] sm:$0xff]  ;;  %v146_v35 = vld [vmem:[#allocation8 + $0x138] sm:$0xff] }
  0x49   :  { %417 = vmatpush1.msra.mxu0 %v165_v17  ;;  %352 = vmatpush1.msra.mxu1 %v151_v20  ;;  %v135_v36 = vld [vmem:[#allocation8 + $0xe0] sm:$0xff]  ;;  %v145_v37 = vld [vmem:[#allocation8 + $0x130] sm:$0xff]  ;;  %v132_v38 = vld [vmem:[#allocation8 + $0xc8] sm:$0xff] }
  0x4a   :  { %418 = vmatprep.subr.mxu0 %v162_v19  ;;  %353 = vmatprep.subr.mxu1 %v148_v22  ;;  %v142_v39 = vld [vmem:[#allocation8 + $0x118] sm:$0xff]  ;;  %v131_v40 = vld [vmem:[#allocation8 + $0xc0] sm:$0xff]  ;;  %v141_v41 = vld [vmem:[#allocation8 + $0x110] sm:$0xff] }
  0x4b   :  { %419 = vmatpush1.msra.mxu0 %v161_v21  ;;  %354 = vmatpush1.msra.mxu1 %v147_v24  ;;  %v128_v42 = vld [vmem:[#allocation8 + $0xa8] sm:$0xff]  ;;  %v138_v43 = vld [vmem:[#allocation8 + $0xf8] sm:$0xff]  ;;  %v127_v44 = vld [vmem:[#allocation8 + $0xa0] sm:$0xff] }
  0x4c   :  { %420 = vmatprep.subr.mxu0 %v158_v23  ;;  %355 = vmatprep.subr.mxu1 %v144_v26  ;;  %v137_v45 = vld [vmem:[#allocation8 + $0xf0] sm:$0xff]  ;;  %v124_v46 = vld [vmem:[#allocation8 + $0x88] sm:$0xff]  ;;  %v134_v47 = vld [vmem:[#allocation8 + $0xd8] sm:$0xff] }
  0x4d   :  { %421 = vmatpush1.msra.mxu0 %v157_v25  ;;  %356 = vmatpush1.msra.mxu1 %v143_v28  ;;  %v123_v48 = vld [vmem:[#allocation8 + $0x80] sm:$0xff]  ;;  %v133_v49 = vld [vmem:[#allocation8 + $0xd0] sm:$0xff]  ;;  %v120_v50 = vld [vmem:[#allocation8 + $0x68] sm:$0xff] }
  0x4e   :  { %422 = vmatprep.subr.mxu0 %v154_v27  ;;  %357 = vmatprep.subr.mxu1 %v140_v30  ;;  %v130_v51 = vld [vmem:[#allocation8 + $0xb8] sm:$0xff]  ;;  %v119_v52 = vld [vmem:[#allocation8 + $0x60] sm:$0xff]  ;;  %v129_v53 = vld [vmem:[#allocation8 + $0xb0] sm:$0xff] }
  0x4f   :  { %423 = vmatpush1.msra.mxu0 %v153_v29  ;;  %358 = vmatpush1.msra.mxu1 %v139_v32  ;;  %v116_v54 = vld [vmem:[#allocation8 + $0x48] sm:$0xff]  ;;  %v126_v55 = vld [vmem:[#allocation8 + $0x98] sm:$0xff]  ;;  %v115_v56 = vld [vmem:[#allocation8 + $0x40] sm:$0xff] }
  0x50   :  { %424 = vmatprep.subr.mxu0 %v150_v31  ;;  %359 = vmatprep.subr.mxu1 %v136_v34  ;;  %v125_v57 = vld [vmem:[#allocation8 + $0x90] sm:$0xff]  ;;  %v112_v58 = vld [vmem:[#allocation8 + $0x28] sm:$0xff]  ;;  %v122_v59 = vld [vmem:[#allocation8 + $0x78] sm:$0xff] }
  0x51   :  { %425 = vmatpush1.msra.mxu0 %v149_v33  ;;  %360 = vmatpush1.msra.mxu1 %v135_v36  ;;  %v111_v60 = vld [vmem:[#allocation8 + $0x20] sm:$0xff]  ;;  %v121_v61 = vld [vmem:[#allocation8 + $0x70] sm:$0xff]  ;;  %v108_v62 = vld [vmem:[#allocation8 + $0x8] sm:$0xff] }
  0x52   :  { %426 = vmatprep.subr.mxu0 %v146_v35  ;;  %361 = vmatprep.subr.mxu1 %v132_v38  ;;  %v118_v63 = vld [vmem:[#allocation8 + $0x58] sm:$0xff]  ;;  %v107_v1 = vld [vmem:[#allocation8] sm:$0xff]  ;;  %v117_v2 = vld [vmem:[#allocation8 + $0x50] sm:$0xff] }
  0x53   :  { %427 = vmatpush1.msra.mxu0 %v145_v37  ;;  %362 = vmatpush1.msra.mxu1 %v131_v40  ;;  %v232_v3 = vld [vmem:[#allocation8 + $0x3e8] sm:$0xff]  ;;  %v114_v4 = vld [vmem:[#allocation8 + $0x38] sm:$0xff]  ;;  %v231_v5 = vld [vmem:[#allocation8 + $0x3e0] sm:$0xff] }
  0x54   :  { %428 = vmatprep.subr.mxu0 %v142_v39  ;;  %363 = vmatprep.subr.mxu1 %v128_v42  ;;  %v113_v6 = vld [vmem:[#allocation8 + $0x30] sm:$0xff]  ;;  %v228_v7 = vld [vmem:[#allocation8 + $0x3c8] sm:$0xff]  ;;  %v110_v8 = vld [vmem:[#allocation8 + $0x18] sm:$0xff] }
  0x55   :  { %429 = vmatpush1.msra.mxu0 %v141_v41  ;;  %364 = vmatpush1.msra.mxu1 %v127_v44  ;;  %v227_v9 = vld [vmem:[#allocation8 + $0x3c0] sm:$0xff]  ;;  %v109_v10 = vld [vmem:[#allocation8 + $0x10] sm:$0xff]  ;;  %v224_v11 = vld [vmem:[#allocation8 + $0x3a8] sm:$0xff] }
  0x56   :  { %430 = vmatprep.subr.mxu0 %v138_v43  ;;  %365 = vmatprep.subr.mxu1 %v124_v46  ;;  %v234_v12 = vld [vmem:[#allocation8 + $0x3f8] sm:$0xff]  ;;  %v223_v13 = vld [vmem:[#allocation8 + $0x3a0] sm:$0xff]  ;;  %v233_v14 = vld [vmem:[#allocation8 + $0x3f0] sm:$0xff] }
  0x57   :  { %431 = vmatpush1.msra.mxu0 %v137_v45  ;;  %366 = vmatpush1.msra.mxu1 %v123_v48  ;;  %v220_v15 = vld [vmem:[#allocation8 + $0x388] sm:$0xff]  ;;  %v230_v16 = vld [vmem:[#allocation8 + $0x3d8] sm:$0xff]  ;;  %v219_v17 = vld [vmem:[#allocation8 + $0x380] sm:$0xff] }
  0x58   :  { %432 = vmatprep.subr.mxu0 %v134_v47  ;;  %367 = vmatprep.subr.mxu1 %v120_v50  ;;  %v229_v18 = vld [vmem:[#allocation8 + $0x3d0] sm:$0xff]  ;;  %v216_v19 = vld [vmem:[#allocation8 + $0x368] sm:$0xff]  ;;  %v226_v20 = vld [vmem:[#allocation8 + $0x3b8] sm:$0xff] }
  0x59   :  { %433 = vmatpush1.msra.mxu0 %v133_v49  ;;  %368 = vmatpush1.msra.mxu1 %v119_v52  ;;  %v215_v21 = vld [vmem:[#allocation8 + $0x360] sm:$0xff]  ;;  %v225_v22 = vld [vmem:[#allocation8 + $0x3b0] sm:$0xff]  ;;  %v212_v23 = vld [vmem:[#allocation8 + $0x348] sm:$0xff] }
  0x5a   :  { %434 = vmatprep.subr.mxu0 %v130_v51  ;;  %369 = vmatprep.subr.mxu1 %v116_v54  ;;  %v222_v24 = vld [vmem:[#allocation8 + $0x398] sm:$0xff]  ;;  %v211_v25 = vld [vmem:[#allocation8 + $0x340] sm:$0xff]  ;;  %v221_v26 = vld [vmem:[#allocation8 + $0x390] sm:$0xff] }
  0x5b   :  { %435 = vmatpush1.msra.mxu0 %v129_v53  ;;  %370 = vmatpush1.msra.mxu1 %v115_v56  ;;  %v208_v27 = vld [vmem:[#allocation8 + $0x328] sm:$0xff]  ;;  %v218_v28 = vld [vmem:[#allocation8 + $0x378] sm:$0xff]  ;;  %v207_v29 = vld [vmem:[#allocation8 + $0x320] sm:$0xff] }
  0x5c   :  { %436 = vmatprep.subr.mxu0 %v126_v55  ;;  %371 = vmatprep.subr.mxu1 %v112_v58  ;;  %v217_v30 = vld [vmem:[#allocation8 + $0x370] sm:$0xff]  ;;  %v204_v31 = vld [vmem:[#allocation8 + $0x308] sm:$0xff]  ;;  %v214_v32 = vld [vmem:[#allocation8 + $0x358] sm:$0xff] }
  0x5d   :  { %437 = vmatpush1.msra.mxu0 %v125_v57  ;;  %372 = vmatpush1.msra.mxu1 %v111_v60  ;;  %v203_v33 = vld [vmem:[#allocation8 + $0x300] sm:$0xff]  ;;  %v213_v34 = vld [vmem:[#allocation8 + $0x350] sm:$0xff]  ;;  %v200_v35 = vld [vmem:[#allocation8 + $0x2e8] sm:$0xff] }
  0x5e   :  { %438 = vmatprep.subr.mxu0 %v122_v59  ;;  %373 = vmatprep.subr.mxu1 %v108_v62  ;;  %v210_v36 = vld [vmem:[#allocation8 + $0x338] sm:$0xff]  ;;  %v199_v37 = vld [vmem:[#allocation8 + $0x2e0] sm:$0xff]  ;;  %v209_v38 = vld [vmem:[#allocation8 + $0x330] sm:$0xff] }
  0x5f   :  { %439 = vmatpush1.msra.mxu0 %v121_v61  ;;  %374 = vmatpush1.msra.mxu1 %v107_v1  ;;  %v196_v39 = vld [vmem:[#allocation8 + $0x2c8] sm:$0xff]  ;;  %v206_v40 = vld [vmem:[#allocation8 + $0x318] sm:$0xff]  ;;  %v195_v41 = vld [vmem:[#allocation8 + $0x2c0] sm:$0xff] }
  0x60   :  { %440 = vmatprep.subr.mxu0 %v118_v63  ;;  %375 = vmatprep.subr.mxu1 %v232_v3  ;;  %v205_v42 = vld [vmem:[#allocation8 + $0x310] sm:$0xff]  ;;  %v192_v43 = vld [vmem:[#allocation8 + $0x2a8] sm:$0xff]  ;;  %v202_v44 = vld [vmem:[#allocation8 + $0x2f8] sm:$0xff] }
  0x61   :  { %441 = vmatpush1.msra.mxu0 %v117_v2  ;;  %376 = vmatpush2.msra.mxu1 %v231_v5  ;;  %v191_v45 = vld [vmem:[#allocation8 + $0x2a0] sm:$0xff]  ;;  %v201_v46 = vld [vmem:[#allocation8 + $0x2f0] sm:$0xff]  ;;  %v188_v47 = vld [vmem:[#allocation8 + $0x288] sm:$0xff] }
  0x62   :  { %442 = vmatprep.subr.mxu0 %v114_v4  ;;  %377 = vmatprep.subr.mxu1 %v228_v7  ;;  %v198_v48 = vld [vmem:[#allocation8 + $0x2d8] sm:$0xff]  ;;  %v187_v49 = vld [vmem:[#allocation8 + $0x280] sm:$0xff]  ;;  %v197_v50 = vld [vmem:[#allocation8 + $0x2d0] sm:$0xff] }
  0x63   :  { %443 = vmatpush1.msra.mxu0 %v113_v6  ;;  %378 = vmatpush2.msra.mxu1 %v227_v9  ;;  %v184_v51 = vld [vmem:[#allocation8 + $0x268] sm:$0xff]  ;;  %v194_v52 = vld [vmem:[#allocation8 + $0x2b8] sm:$0xff]  ;;  %v183_v53 = vld [vmem:[#allocation8 + $0x260] sm:$0xff] }
  0x64   :  { %444 = vmatprep.subr.mxu0 %v110_v8  ;;  %379 = vmatprep.subr.mxu1 %v224_v11  ;;  %v193_v54 = vld [vmem:[#allocation8 + $0x2b0] sm:$0xff]  ;;  %v180_v55 = vld [vmem:[#allocation8 + $0x248] sm:$0xff]  ;;  %v190_v56 = vld [vmem:[#allocation8 + $0x298] sm:$0xff] }
  0x65   :  { %445 = vmatpush1.msra.mxu0 %v109_v10  ;;  %380 = vmatpush2.msra.mxu1 %v223_v13  ;;  %v189_v57 = vld [vmem:[#allocation8 + $0x290] sm:$0xff]  ;;  %v186_v58 = vld [vmem:[#allocation8 + $0x278] sm:$0xff]  ;;  %v179_v61 = vld [vmem:[#allocation8 + $0x240] sm:$0xff] }
  0x66   :  { %446 = vmatprep.subr.mxu0 %v234_v12  ;;  %381 = vmatprep.subr.mxu1 %v220_v15  ;;  %v185_v59 = vld [vmem:[#allocation8 + $0x270] sm:$0xff]  ;;  %v182_v60 = vld [vmem:[#allocation8 + $0x258] sm:$0xff]  ;;  %v176_v63 = vld [vmem:[#allocation8 + $0x228] sm:$0xff]  ;;  %v822_v15 = vmov 0  }
  0x67   :  { %447 = vmatpush2.msra.mxu0 %v233_v14  ;;  %382 = vmatpush2.msra.mxu1 %v219_v17  ;;  %v181_v62 = vld [vmem:[#allocation8 + $0x250] sm:$0xff]  ;;  %v178_v1 = vld [vmem:[#allocation8 + $0x238] sm:$0xff]  ;;  %v175_v2 = vld [vmem:[#allocation8 + $0x220] sm:$0xff] }
  0x68   :  { %448 = vmatprep.subr.mxu0 %v230_v16  ;;  %383 = vmatprep.subr.mxu1 %v216_v19  ;;  %v177_v3 = vld [vmem:[#allocation8 + $0x230] sm:$0xff]  ;;  %v172_v4 = vld [vmem:[#allocation8 + $0x208] sm:$0xff]  ;;  %v174_v5 = vld [vmem:[#allocation8 + $0x218] sm:$0xff]  ;;  %v323_v16 = vlaneseq }
  0x69   :  { %449 = vmatpush2.msra.mxu0 %v229_v18  ;;  %384 = vmatpush2.msra.mxu1 %v215_v21  ;;  %v171_v6 = vld [vmem:[#allocation8 + $0x200] sm:$0xff]  ;;  %v97_v7 = vld [vmem:[#allocation6] sm:$0xff]  ;;  %v173_v8 = vld [vmem:[#allocation8 + $0x210] sm:$0xff] }
  0x6a   :  { %450 = vmatprep.subr.mxu0 %v226_v20  ;;  %385 = vmatprep.subr.mxu1 %v212_v23  ;;  %v613_v9 = vld [vmem:[%s926_s3] ss:$0 sm:$0xff]  ;;  %v324_v17 = vshrl.u32 %v323_v16, 7  ;;  %v104_v19 = vld [vmem:[#allocation9] sm:$0xf]  ;;  %s823_s3 = smov [#allocation13]  }
  0x6b   :  { %451 = vmatpush2.msra.mxu0 %v225_v22  ;;  %386 = vmatpush2.msra.mxu1 %v211_v25  ;;  %v106_v14 = vld [vmem:[%s930_s7] sm:$0xff]  ;;  %s598_s7 = sshll.u32 %s823_s3, 4  ;;  %s599_s7 = int_to_ptr.vmem [resolvable:$true] %s598_s7 }
  0x6c   :  { %452 = vmatprep.subr.mxu0 %v222_v24  ;;  %387 = vmatprep.subr.mxu1 %v208_v27  ;;  %v325_v18 = vsub.s32 0, %v324_v17  ;;  %v329_v21 = vsub.s32 1, %v324_v17  ;;  %s763_s21 = scalar_lea.vmem %s599_s7, 128  ;;  %p768_p12 = scmp.lt.s32.totalorder %s599_s7, %s599_s7 }
  0x6d   :  { %453 = vmatpush2.msra.mxu0 %v221_v26  ;;  %388 = vmatpush2.msra.mxu1 %v207_v29  ;;  %p764_p11 = scmp.ne.s32.totalorder %s599_s7, %s763_s21  ;;  %p769_p13 = scmp.lt.s32.totalorder %s763_s21, %s763_s21 }
  0x6e   :  { %454 = vmatprep.subr.mxu0 %v218_v28  ;;  %389 = vmatprep.subr.mxu1 %v204_v31  ;;  %v326_v20 = vrot.slane %v104_v19, %v325_v18  ;;  %v330_v25 = vrot.slane %v104_v19, %v329_v21 }
  0x6f   :  { %455 = vmatpush2.msra.mxu0 %v217_v30  ;;  %390 = vmatpush2.msra.mxu1 %v203_v33  ;;  %v337_v30 = vsub.s32 3, %v324_v17  ;;  %p770_p0 = por %p769_p13, %p768_p12 }
  0x70   :  { %456 = vmatprep.subr.mxu0 %v214_v32  ;;  %391 = vmatprep.subr.mxu1 %v200_v35  ;;  %v333_v32 = vsub.s32 2, %v324_v17 }
  0x71   :  { %457 = vmatpush2.msra.mxu0 %v213_v34  ;;  %392 = vmatpush2.msra.mxu1 %v199_v37  ;;  %v338_v34 = vrot.slane %v104_v19, %v337_v30  ;;  %p771_p1 = pnand %p770_p0, %p764_p11 }
  0x72   :  { %458 = vmatprep.subr.mxu0 %v210_v36  ;;  %393 = vmatprep.subr.mxu1 %v196_v39  ;;  %v334_v36 = vrot.slane %v104_v19, %v333_v32 }
  0x73   :  { %459 = vmatpush2.msra.mxu0 %v209_v38  ;;  %394 = vmatpush2.msra.mxu1 %v195_v41 }
  0x74   :  { %460 = vmatprep.subr.mxu0 %v206_v40  ;;  %395 = vmatprep.subr.mxu1 %v192_v43 }
  0x75   :  { %461 = vmatpush2.msra.mxu0 %v205_v42  ;;  %396 = vmatpush2.msra.mxu1 %v191_v45 }
  0x76   :  { %462 = vmatprep.subr.mxu0 %v202_v44  ;;  %397 = vmatprep.subr.mxu1 %v188_v47 }
  0x77   :  { %463 = vmatpush2.msra.mxu0 %v201_v46  ;;  %398 = vmatpush2.msra.mxu1 %v187_v49  ;;  %v105_v49 = vld [vmem:[#allocation11] sm:$0xff] }
  0x78   :  { %464 = vmatprep.subr.mxu0 %v198_v48  ;;  %399 = vmatprep.subr.mxu1 %v184_v51 }
  0x79   :  { %465 = vmatpush2.msra.mxu0 %v197_v50  ;;  %400 = vmatpush2.msra.mxu1 %v183_v53 }
  0x7a   :  { %466 = vmatprep.subr.mxu0 %v194_v52  ;;  %401 = vmatprep.subr.mxu1 %v180_v55 }
  0x7b   :  { %467 = vmatpush2.msra.mxu0 %v193_v54  ;;  %402 = vmatpush2.msra.mxu1 %v179_v61 }
  0x7c   :  { %468 = vmatprep.subr.mxu0 %v190_v56  ;;  %403 = vmatprep.subr.mxu1 %v176_v63 }
  0x7d   :  { %469 = vmatpush2.msra.mxu0 %v189_v57  ;;  %404 = vmatpush2.msra.mxu1 %v175_v2 }
  0x7e   :  { %470 = vmatprep.subr.mxu0 %v186_v58  ;;  %405 = vmatprep.subr.mxu1 %v172_v4 }
  0x7f   :  { %471 = vmatpush2.msra.mxu0 %v185_v59  ;;  %406 = vmatpush2.msra.mxu1 %v171_v6 }
  0x80   :  { %472 = vmatprep.subr.mxu0 %v182_v60  ;;  %407 = vmatprep.mubr.f32.mxu1 %v97_v7 }
  0x81   :  { %473 = vmatpush2.msra.mxu0 %v181_v62  ;;  %478 = vmatprep.mubr.f32.mxu0 %v97_v7 }
  0x82   :  { %474 = vmatprep.subr.mxu0 %v178_v1  ;;  %635 = vmatprep.subr.mxu1 %v820_v0 }
  0x83   :  { %475 = vmatpush2.msra.mxu0 %v177_v3  ;;  %652 = vset.pattern.permute.xlu0 %v822_v15 }
  0x84   :  { %476 = vmatprep.subr.mxu0 %v174_v5  ;;  %506 = vperm.xlu0 %652, %v106_v14  }
  0x85   :  { %477 = vmatpush2.msra.mxu0 %v173_v8 }
 0x106   :  { %v313_v10 = vpop.f32.mrf.mxu0 }
 0x107   :  { %v314_v11 = vadd.f32 %v613_v9, %v313_v10 }
 0x108   :  { %v634_v12 = vpop.f32.mrf.mxu0 }
 0x109   :  { %v317_v13 = vmax.f32 %v314_v11, 0.0 }
 0x10b   :  { %408 = vmatmul.mubr.f32.vlgmr.msra.gmra.mxu1 %v317_v13  ;;  %479 = vmatmul.mubr.f32.vlgmr.msra.gmra.mxu0 %v317_v13 }
 0x10c   :  { %637 = vmatprep.mubr.msk.f32.mxu1 %vm821_vm0, %v820_v0 }
 0x1cb   :  { %v409_v22 = vpop.f32.mrf.mxu1  ;;  %v480_v31 = vpop.f32.mrf.mxu0 }
 0x1cc   :  { %v410_v23 = vadd.f32 %v409_v22, %v326_v20  ;;  %v481_v40 = vadd.f32 %v480_v31, %v334_v36 }
 0x1cd   :  { %v411_v26 = vpop.f32.mrf.mxu1  ;;  %v482_v35 = vpop.f32.mrf.mxu0 }
 0x1ce   :  { %v615_v24 = vmul.f32 -1.442695, %v410_v23  ;;  %v412_v0 = vadd.f32 %v411_v26, %v330_v25  ;;  %v483_v38 = vadd.f32 %v482_v35, %v338_v34 }
 0x1d0   :  { %653 = vpow2.f32 %v615_v24  ;;  %v616_v27 = vmul.f32 -1.442695, %v412_v0 }
 0x1d2   :  { %655 = vpow2.f32 %v616_v27 }
 0x1dd   :  { %v654_v28 = vpop.eup %653 }
 0x1de   :  { %v488_v29 = vadd.f32 1.0, %v654_v28 }
 0x1df   :  { %v656_v33 = vpop.eup %655 }
 0x1e0   :  { %657 = vrcp.f32 %v488_v29  ;;  %v494_v37 = vadd.f32 1.0, %v656_v33 }
 0x1e2   :  { %659 = vrcp.f32 %v494_v37 }
 0x1ed   :  { %v658_v39 = vpop.eup %657 }
 0x1ee   :  { %v497_v41 = vmul.f32 %v658_v39, %v483_v38 }
 0x1ef   :  { %v660_v43 = vpop.eup %659 }
 0x1f0   :  { %v498_v42 = vadd.f32 %v497_v41, %v481_v40  ;;  %v500_v44 = vsub.f32 1.0, %v660_v43  ;;  %v502_v47 = vmul.f32 %v660_v43, %v97_v7 }
 0x1f2   :  { %661 = vtanh.f32 %v498_v42 }
 0x1ff   :  { %v662_v45 = vpop.eup %661 }
 0x200   :  { %v501_v46 = vmul.f32 %v662_v45, %v500_v44 }
 0x202   :  { %v503_v48 = vadd.f32 %v502_v47, %v501_v46 }
 0x204   :  { %636 = vmatpush3.xpose.msra.mxu1 %v503_v48  ;;  %581 = vst [vmem:[#allocation13] sm:$0xff] %v503_v48 }
 0x207   :  { %638 = vmatmul.mubr.f32.vlgmr.msra.gmra.mxu1 %v105_v49 }
 0x208   :  { %774 = shalt.err (!%p771_p1)
}
 0x209   :  { %601 = dma.vmem_to_hbm [thread:$0]  %s599_s7, 128, %s932_s9, [#allocation14]   ;;  %v507_v50 = vpop.permute.xlu0 %506  ;;  %vm579_vm2 = vcmask 64512  }
 0x20a   :  { %s824_s1 = smov [#allocation12]  }
 0x20b   :  { %s588_s24 = sshll.u32 %s824_s1, 4  ;;  %s589_s24 = int_to_ptr.vmem [resolvable:$true] %s588_s24 }
 0x20c   :  { %s783_s25 = scalar_lea.vmem %s589_s24, 128  ;;  %p788_p3 = scmp.lt.s32.totalorder %s589_s24, %s589_s24 }
 0x20d   :  { %p784_p2 = scmp.ne.s32.totalorder %s589_s24, %s783_s25  ;;  %p789_p4 = scmp.lt.s32.totalorder %s783_s25, %s783_s25 }
 0x20f   :  { %p790_p5 = por %p789_p4, %p788_p3 }
 0x211   :  { %p791_p6 = pnand %p790_p5, %p784_p2 }
 0x2c7   :  { %v575_v51 = vpop.f32.mrf.mxu1 }
 0x2c8   :  { %v576_v52 = vadd.f32 %v575_v51, %v507_v50 }
 0x2c9   :  { %v639_v53 = vpop.f32.mrf.mxu1 }
 0x2ca   :  { %580 = vst.msk [vmem:[#allocation12] sm:$0xff] %vm579_vm2, %v576_v52 }
 0x2cb   :  { %794 = shalt.err (!%p791_p6)
}
 0x2cc   :  { %591 = dma.vmem_to_hbm [thread:$0]  %s589_s24, 128, %s931_s8, [#allocation5]  }
 0x2cd   :  { %809 = dma.done.wait [#allocation5], 128  }
 0x2ce   :  { %810 = vsyncadd [#allocation5], 4294967168 }
 0x2cf   :  { %811 = dma.done.wait [#allocation14], 128  }
 0x2d0   :  { %812 = vsyncadd [#allocation14], 4294967168 }
 0x2d1   :  { %608 = vsyncpa [#allocation4], 1 }
 0x2d2   :  { %609 = vsyncpa [#allocation7], 1 }
 0x2d3   :  { %610 = vsyncpa [#allocation10], 1 }
 0x2d4   :  { %611 = vsyncpa [#allocation5], 1 }
 0x2d5   :  { %612 = vsyncpa [#allocation14], 1 }

</bundles_post_ra>
